<compile_context>
chip_gen: v7x
topology: tpu7x:2x2x1
jax: 0.10.0
libtpu: 0.0.40
codegen_flags: <defaults>
</compile_context>

<pallas_src>
import jax
import jax.numpy as jnp
from jax.experimental import pallas as pl
from jax.experimental.pallas import tpu as pltpu


def _round_up(n, m):
    return ((n + m - 1) // m) * m


def _namenet_kernel(x_ref, p_ref, o_ref):
    """All four Linear+Sigmoid layers fused.

    x_ref: VMEM [F, 8, TL]   batch packed as (sublane=8, lane=TL) full-vreg slabs
    p_ref: SMEM [n_params]   all weights/biases packed row-major per layer (W then b)
    o_ref: VMEM [2, 8, TL]
    """

    def sigmoid(z):
        # exp-free sigmoid: single EUP tanh + VPU fma; equals 1/(1+exp(-z))
        # to f32 rounding (no vector divide, no approx-reciprocal error).
        return 0.5 * jnp.tanh(0.5 * z) + 0.5

    # Split the input block into its (at most 6) feature slabs: each is a
    # full-vreg-occupancy (8, TL) slab.
    rows = [x_ref[k] for k in range(x_ref.shape[0])]

    base = 0
    out_dim = 2
    for _layer in range(4):                 # fully unrolled: 4 tiny layers
        in_dim = len(rows)
        new_rows = []
        for j in range(out_dim):            # out_dim == 2
            z = rows[0] * p_ref[base + j * in_dim]          # scalar (SMEM) * vector
            for k in range(1, in_dim):      # in_dim in {6, 2}
                z = z + rows[k] * p_ref[base + j * in_dim + k]
            z = z + p_ref[base + out_dim * in_dim + j]      # bias
            new_rows.append(sigmoid(z))
        rows = new_rows
        base += out_dim * in_dim + out_dim

    o_ref[0] = rows[0]                      # unmasked, lane-dense (8, TL) stores
    o_ref[1] = rows[1]


def prepare_params(params):
    """One-time pack of PyTorch-convention params into a single 1-D f32 vector.

    Layout per layer i=1..4: W_i flattened row-major ([out, in]) then b_i.
    (One 1-D SMEM array avoids eight separately padded SMEM allocations.)
    """
    parts = []
    for i in (1, 2, 3, 4):
        parts.append(jnp.asarray(params[f"layer{i}_w"], jnp.float32).reshape(-1))
        parts.append(jnp.asarray(params[f"layer{i}_b"], jnp.float32).reshape(-1))
    return jnp.concatenate(parts)


def namenet_forward(x, packed_params, *, tb_max=131072):
    """x: [B, F] float; packed_params: output of prepare_params(). Returns [B, 2]."""
    B, F = x.shape

    # Pad the batch only to a multiple of 1024 (8 sublanes x 128 lanes), NOT to
    # a full tile; the grid's last block may be ragged.
    b_pad = _round_up(max(B, 1), 1024)

    # Batch tile: multiple of 1024, capped so (a) VMEM stays small and (b) there
    # are at least 2 tiles whenever the batch allows it (v7x megacore split).
    tb_max = max(1024, _round_up(tb_max, 1024))
    tb = min(tb_max, b_pad)
    if b_pad >= 2048:
        tb = min(tb, _round_up(b_pad // 2, 1024))
    tl = tb // 8                       # lane extent per block (multiple of 128)
    m = b_pad // 8                     # lane extent of the packed arrays

    # Single fused pass: cast + transpose + pad lower to one copy fusion.
    xt = jnp.pad(jnp.asarray(x, jnp.float32).T, ((0, 0), (0, b_pad - B)))
    # Free (same-bytes) reshape: pack batch into 8 sublanes x m lanes.
    xp = xt.reshape(F, 8, m)

    grid = (pl.cdiv(m, tl),)

    out = pl.pallas_call(
        _namenet_kernel,
        out_shape=jax.ShapeDtypeStruct((2, 8, m), jnp.float32),
        grid_spec=pltpu.PrefetchScalarGridSpec(
            num_scalar_prefetch=0,
            grid=grid,
            in_specs=[
                pl.BlockSpec((F, 8, tl), lambda i: (0, 0, i)),      # x: tiled over batch
                pl.BlockSpec(memory_space=pltpu.MemorySpace.SMEM),  # params resident
            ],
            out_specs=pl.BlockSpec((2, 8, tl), lambda i: (0, 0, i)),
        ),
        compiler_params=pltpu.CompilerParams(
            dimension_semantics=("parallel",),       # shard batch tiles across TCs (v7x)
            vmem_limit_bytes=32 * 1024 * 1024,
        ),
    )(xp, packed_params)

    # Unpack: free reshape back to [2, b_pad], drop padding, tiny un-transpose.
    return out.reshape(2, b_pad)[:, :B].T


def init_params(key, initial_input_size):
    """Deterministic PyTorch-style init: U(-1/sqrt(fan_in), 1/sqrt(fan_in))."""
    sizes = [(2, initial_input_size), (2, 2), (2, 2), (2, 2)]
    params = {}
    for i, (out_f, in_f) in enumerate(sizes, start=1):
        key, kw, kb = jax.random.split(key, 3)
        bound = 1.0 / jnp.sqrt(jnp.float32(in_f))
        params[f"layer{i}_w"] = jax.random.uniform(
            kw, (out_f, in_f), jnp.float32, minval=-bound, maxval=bound)
        params[f"layer{i}_b"] = jax.random.uniform(
            kb, (out_f,), jnp.float32, minval=-bound, maxval=bound)
    return params


def _reference_forward(x, params):
    h = jnp.asarray(x, jnp.float32)
    for i in (1, 2, 3, 4):
        w = jnp.asarray(params[f"layer{i}_w"], jnp.float32)
        b = jnp.asarray(params[f"layer{i}_b"], jnp.float32)
        z = h @ w.T + b
        h = 1.0 / (1.0 + jnp.exp(-z))
    return h


if __name__ == "__main__":
    key = jax.random.PRNGKey(0)
    initial_input_size = 6   # get_name_tensor produces a 6-feature vector
    batch = 8

    key, kx, kp = jax.random.split(key, 3)
    # Name features are char-hashes; emulate with small positive floats.
    x = jax.random.uniform(kx, (batch, initial_input_size), jnp.float32,
                           minval=0.0, maxval=1.0)
    params = init_params(kp, initial_input_size)
    kparams = prepare_params(params)

    # Small-batch path (single tile, grid of 1).
    fwd = jax.jit(namenet_forward)
    out = jax.block_until_ready(fwd(x, kparams))
    ref = _reference_forward(x, params)
    assert out.shape == (batch, 2)
    assert jnp.allclose(out, ref, atol=1e-5, rtol=1e-5)

    # Multi-tile path with a ragged last block: b_pad=3072 -> m=384, tile
    # tl=256 -> grid=(2,), last block covers only 128 of 256 lanes.
    key, kx2 = jax.random.split(key)
    batch2 = 3000
    x2 = jax.random.uniform(kx2, (batch2, initial_input_size), jnp.float32,
                            minval=0.0, maxval=1.0)
    fwd_tiled = jax.jit(lambda a, p: namenet_forward(a, p, tb_max=2048))
    out2 = jax.block_until_ready(fwd_tiled(x2, kparams))
    ref2 = _reference_forward(x2, params)
    assert out2.shape == (batch2, 2)
    assert jnp.allclose(out2, ref2, atol=1e-5, rtol=1e-5)

    print("KERNEL_OK")
</pallas_src>

<mosaic_0001>
module attributes {stable_mosaic.version = 11 : i64} {
  func.func @_namenet_kernel(%arg0: i32, %arg1: memref<6x8x128xf32, #tpu.memory_space<vmem>>, %arg2: memref<32xf32, #tpu.memory_space<smem>>, %arg3: memref<2x8x128xf32, #tpu.memory_space<vmem>>) attributes {dimension_semantics = [#tpu.dimension_semantics<parallel>], iteration_bounds = array<i64: 1>, scalar_prefetch = 0 : i64, scratch_operands = 0 : i64, tpu.core_type = #tpu.core_type<tc>, window_params = [{transform_indices = @transform_0, window_bounds = array<i64: 6, 8, 128>}, {transform_indices = @transform_1, window_bounds = array<i64: 32>}, {transform_indices = @transform_2, window_bounds = array<i64: 2, 8, 128>}]} {
    %c0 = arith.constant 0 : index
    %c0_0 = arith.constant 0 : index
    %c0_1 = arith.constant 0 : index
    %0 = vector.load %arg1[%c0, %c0_0, %c0_1] : memref<6x8x128xf32, #tpu.memory_space<vmem>>, vector<1x8x128xf32>
    %1 = vector.shape_cast %0 : vector<1x8x128xf32> to vector<8x128xf32>
    %c1 = arith.constant 1 : index
    %c0_2 = arith.constant 0 : index
    %c0_3 = arith.constant 0 : index
    %2 = vector.load %arg1[%c1, %c0_2, %c0_3] : memref<6x8x128xf32, #tpu.memory_space<vmem>>, vector<1x8x128xf32>
    %3 = vector.shape_cast %2 : vector<1x8x128xf32> to vector<8x128xf32>
    %c2 = arith.constant 2 : index
    %c0_4 = arith.constant 0 : index
    %c0_5 = arith.constant 0 : index
    %4 = vector.load %arg1[%c2, %c0_4, %c0_5] : memref<6x8x128xf32, #tpu.memory_space<vmem>>, vector<1x8x128xf32>
    %5 = vector.shape_cast %4 : vector<1x8x128xf32> to vector<8x128xf32>
    %c3 = arith.constant 3 : index
    %c0_6 = arith.constant 0 : index
    %c0_7 = arith.constant 0 : index
    %6 = vector.load %arg1[%c3, %c0_6, %c0_7] : memref<6x8x128xf32, #tpu.memory_space<vmem>>, vector<1x8x128xf32>
    %7 = vector.shape_cast %6 : vector<1x8x128xf32> to vector<8x128xf32>
    %c4 = arith.constant 4 : index
    %c0_8 = arith.constant 0 : index
    %c0_9 = arith.constant 0 : index
    %8 = vector.load %arg1[%c4, %c0_8, %c0_9] : memref<6x8x128xf32, #tpu.memory_space<vmem>>, vector<1x8x128xf32>
    %9 = vector.shape_cast %8 : vector<1x8x128xf32> to vector<8x128xf32>
    %c5 = arith.constant 5 : index
    %c0_10 = arith.constant 0 : index
    %c0_11 = arith.constant 0 : index
    %10 = vector.load %arg1[%c5, %c0_10, %c0_11] : memref<6x8x128xf32, #tpu.memory_space<vmem>>, vector<1x8x128xf32>
    %11 = vector.shape_cast %10 : vector<1x8x128xf32> to vector<8x128xf32>
    %c0_12 = arith.constant 0 : index
    %12 = memref.load %arg2[%c0_12] : memref<32xf32, #tpu.memory_space<smem>>
    %13 = vector.broadcast %12 : f32 to vector<8x128xf32>
    %14 = arith.mulf %1, %13 : vector<8x128xf32>
    %c1_13 = arith.constant 1 : index
    %15 = memref.load %arg2[%c1_13] : memref<32xf32, #tpu.memory_space<smem>>
    %16 = vector.broadcast %15 : f32 to vector<8x128xf32>
    %17 = arith.mulf %3, %16 : vector<8x128xf32>
    %18 = arith.addf %14, %17 : vector<8x128xf32>
    %c2_14 = arith.constant 2 : index
    %19 = memref.load %arg2[%c2_14] : memref<32xf32, #tpu.memory_space<smem>>
    %20 = vector.broadcast %19 : f32 to vector<8x128xf32>
    %21 = arith.mulf %5, %20 : vector<8x128xf32>
    %22 = arith.addf %18, %21 : vector<8x128xf32>
    %c3_15 = arith.constant 3 : index
    %23 = memref.load %arg2[%c3_15] : memref<32xf32, #tpu.memory_space<smem>>
    %24 = vector.broadcast %23 : f32 to vector<8x128xf32>
    %25 = arith.mulf %7, %24 : vector<8x128xf32>
    %26 = arith.addf %22, %25 : vector<8x128xf32>
    %c4_16 = arith.constant 4 : index
    %27 = memref.load %arg2[%c4_16] : memref<32xf32, #tpu.memory_space<smem>>
    %28 = vector.broadcast %27 : f32 to vector<8x128xf32>
    %29 = arith.mulf %9, %28 : vector<8x128xf32>
    %30 = arith.addf %26, %29 : vector<8x128xf32>
    %c5_17 = arith.constant 5 : index
    %31 = memref.load %arg2[%c5_17] : memref<32xf32, #tpu.memory_space<smem>>
    %32 = vector.broadcast %31 : f32 to vector<8x128xf32>
    %33 = arith.mulf %11, %32 : vector<8x128xf32>
    %34 = arith.addf %30, %33 : vector<8x128xf32>
    %c12 = arith.constant 12 : index
    %35 = memref.load %arg2[%c12] : memref<32xf32, #tpu.memory_space<smem>>
    %36 = vector.broadcast %35 : f32 to vector<8x128xf32>
    %37 = arith.addf %34, %36 : vector<8x128xf32>
    %cst = arith.constant 5.000000e-01 : f32
    %38 = vector.broadcast %cst : f32 to vector<8x128xf32>
    %39 = arith.mulf %38, %37 : vector<8x128xf32>
    %40 = math.tanh %39 : vector<8x128xf32>
    %cst_18 = arith.constant 5.000000e-01 : f32
    %41 = vector.broadcast %cst_18 : f32 to vector<8x128xf32>
    %42 = arith.mulf %41, %40 : vector<8x128xf32>
    %cst_19 = arith.constant 5.000000e-01 : f32
    %43 = vector.broadcast %cst_19 : f32 to vector<8x128xf32>
    %44 = arith.addf %42, %43 : vector<8x128xf32>
    %c6 = arith.constant 6 : index
    %45 = memref.load %arg2[%c6] : memref<32xf32, #tpu.memory_space<smem>>
    %46 = vector.broadcast %45 : f32 to vector<8x128xf32>
    %47 = arith.mulf %1, %46 : vector<8x128xf32>
    %c7 = arith.constant 7 : index
    %48 = memref.load %arg2[%c7] : memref<32xf32, #tpu.memory_space<smem>>
    %49 = vector.broadcast %48 : f32 to vector<8x128xf32>
    %50 = arith.mulf %3, %49 : vector<8x128xf32>
    %51 = arith.addf %47, %50 : vector<8x128xf32>
    %c8 = arith.constant 8 : index
    %52 = memref.load %arg2[%c8] : memref<32xf32, #tpu.memory_space<smem>>
    %53 = vector.broadcast %52 : f32 to vector<8x128xf32>
    %54 = arith.mulf %5, %53 : vector<8x128xf32>
    %55 = arith.addf %51, %54 : vector<8x128xf32>
    %c9 = arith.constant 9 : index
    %56 = memref.load %arg2[%c9] : memref<32xf32, #tpu.memory_space<smem>>
    %57 = vector.broadcast %56 : f32 to vector<8x128xf32>
    %58 = arith.mulf %7, %57 : vector<8x128xf32>
    %59 = arith.addf %55, %58 : vector<8x128xf32>
    %c10 = arith.constant 10 : index
    %60 = memref.load %arg2[%c10] : memref<32xf32, #tpu.memory_space<smem>>
    %61 = vector.broadcast %60 : f32 to vector<8x128xf32>
    %62 = arith.mulf %9, %61 : vector<8x128xf32>
    %63 = arith.addf %59, %62 : vector<8x128xf32>
    %c11 = arith.constant 11 : index
    %64 = memref.load %arg2[%c11] : memref<32xf32, #tpu.memory_space<smem>>
    %65 = vector.broadcast %64 : f32 to vector<8x128xf32>
    %66 = arith.mulf %11, %65 : vector<8x128xf32>
    %67 = arith.addf %63, %66 : vector<8x128xf32>
    %c13 = arith.constant 13 : index
    %68 = memref.load %arg2[%c13] : memref<32xf32, #tpu.memory_space<smem>>
    %69 = vector.broadcast %68 : f32 to vector<8x128xf32>
    %70 = arith.addf %67, %69 : vector<8x128xf32>
    %cst_20 = arith.constant 5.000000e-01 : f32
    %71 = vector.broadcast %cst_20 : f32 to vector<8x128xf32>
    %72 = arith.mulf %71, %70 : vector<8x128xf32>
    %73 = math.tanh %72 : vector<8x128xf32>
    %cst_21 = arith.constant 5.000000e-01 : f32
    %74 = vector.broadcast %cst_21 : f32 to vector<8x128xf32>
    %75 = arith.mulf %74, %73 : vector<8x128xf32>
    %cst_22 = arith.constant 5.000000e-01 : f32
    %76 = vector.broadcast %cst_22 : f32 to vector<8x128xf32>
    %77 = arith.addf %75, %76 : vector<8x128xf32>
    %c14 = arith.constant 14 : index
    %78 = memref.load %arg2[%c14] : memref<32xf32, #tpu.memory_space<smem>>
    %79 = vector.broadcast %78 : f32 to vector<8x128xf32>
    %80 = arith.mulf %44, %79 : vector<8x128xf32>
    %c15 = arith.constant 15 : index
    %81 = memref.load %arg2[%c15] : memref<32xf32, #tpu.memory_space<smem>>
    %82 = vector.broadcast %81 : f32 to vector<8x128xf32>
    %83 = arith.mulf %77, %82 : vector<8x128xf32>
    %84 = arith.addf %80, %83 : vector<8x128xf32>
    %c18 = arith.constant 18 : index
    %85 = memref.load %arg2[%c18] : memref<32xf32, #tpu.memory_space<smem>>
    %86 = vector.broadcast %85 : f32 to vector<8x128xf32>
    %87 = arith.addf %84, %86 : vector<8x128xf32>
    %cst_23 = arith.constant 5.000000e-01 : f32
    %88 = vector.broadcast %cst_23 : f32 to vector<8x128xf32>
    %89 = arith.mulf %88, %87 : vector<8x128xf32>
    %90 = math.tanh %89 : vector<8x128xf32>
    %cst_24 = arith.constant 5.000000e-01 : f32
    %91 = vector.broadcast %cst_24 : f32 to vector<8x128xf32>
    %92 = arith.mulf %91, %90 : vector<8x128xf32>
    %cst_25 = arith.constant 5.000000e-01 : f32
    %93 = vector.broadcast %cst_25 : f32 to vector<8x128xf32>
    %94 = arith.addf %92, %93 : vector<8x128xf32>
    %c16 = arith.constant 16 : index
    %95 = memref.load %arg2[%c16] : memref<32xf32, #tpu.memory_space<smem>>
    %96 = vector.broadcast %95 : f32 to vector<8x128xf32>
    %97 = arith.mulf %44, %96 : vector<8x128xf32>
    %c17 = arith.constant 17 : index
    %98 = memref.load %arg2[%c17] : memref<32xf32, #tpu.memory_space<smem>>
    %99 = vector.broadcast %98 : f32 to vector<8x128xf32>
    %100 = arith.mulf %77, %99 : vector<8x128xf32>
    %101 = arith.addf %97, %100 : vector<8x128xf32>
    %c19 = arith.constant 19 : index
    %102 = memref.load %arg2[%c19] : memref<32xf32, #tpu.memory_space<smem>>
    %103 = vector.broadcast %102 : f32 to vector<8x128xf32>
    %104 = arith.addf %101, %103 : vector<8x128xf32>
    %cst_26 = arith.constant 5.000000e-01 : f32
    %105 = vector.broadcast %cst_26 : f32 to vector<8x128xf32>
    %106 = arith.mulf %105, %104 : vector<8x128xf32>
    %107 = math.tanh %106 : vector<8x128xf32>
    %cst_27 = arith.constant 5.000000e-01 : f32
    %108 = vector.broadcast %cst_27 : f32 to vector<8x128xf32>
    %109 = arith.mulf %108, %107 : vector<8x128xf32>
    %cst_28 = arith.constant 5.000000e-01 : f32
    %110 = vector.broadcast %cst_28 : f32 to vector<8x128xf32>
    %111 = arith.addf %109, %110 : vector<8x128xf32>
    %c20 = arith.constant 20 : index
    %112 = memref.load %arg2[%c20] : memref<32xf32, #tpu.memory_space<smem>>
    %113 = vector.broadcast %112 : f32 to vector<8x128xf32>
    %114 = arith.mulf %94, %113 : vector<8x128xf32>
    %c21 = arith.constant 21 : index
    %115 = memref.load %arg2[%c21] : memref<32xf32, #tpu.memory_space<smem>>
    %116 = vector.broadcast %115 : f32 to vector<8x128xf32>
    %117 = arith.mulf %111, %116 : vector<8x128xf32>
    %118 = arith.addf %114, %117 : vector<8x128xf32>
    %c24 = arith.constant 24 : index
    %119 = memref.load %arg2[%c24] : memref<32xf32, #tpu.memory_space<smem>>
    %120 = vector.broadcast %119 : f32 to vector<8x128xf32>
    %121 = arith.addf %118, %120 : vector<8x128xf32>
    %cst_29 = arith.constant 5.000000e-01 : f32
    %122 = vector.broadcast %cst_29 : f32 to vector<8x128xf32>
    %123 = arith.mulf %122, %121 : vector<8x128xf32>
    %124 = math.tanh %123 : vector<8x128xf32>
    %cst_30 = arith.constant 5.000000e-01 : f32
    %125 = vector.broadcast %cst_30 : f32 to vector<8x128xf32>
    %126 = arith.mulf %125, %124 : vector<8x128xf32>
    %cst_31 = arith.constant 5.000000e-01 : f32
    %127 = vector.broadcast %cst_31 : f32 to vector<8x128xf32>
    %128 = arith.addf %126, %127 : vector<8x128xf32>
    %c22 = arith.constant 22 : index
    %129 = memref.load %arg2[%c22] : memref<32xf32, #tpu.memory_space<smem>>
    %130 = vector.broadcast %129 : f32 to vector<8x128xf32>
    %131 = arith.mulf %94, %130 : vector<8x128xf32>
    %c23 = arith.constant 23 : index
    %132 = memref.load %arg2[%c23] : memref<32xf32, #tpu.memory_space<smem>>
    %133 = vector.broadcast %132 : f32 to vector<8x128xf32>
    %134 = arith.mulf %111, %133 : vector<8x128xf32>
    %135 = arith.addf %131, %134 : vector<8x128xf32>
    %c25 = arith.constant 25 : index
    %136 = memref.load %arg2[%c25] : memref<32xf32, #tpu.memory_space<smem>>
    %137 = vector.broadcast %136 : f32 to vector<8x128xf32>
    %138 = arith.addf %135, %137 : vector<8x128xf32>
    %cst_32 = arith.constant 5.000000e-01 : f32
    %139 = vector.broadcast %cst_32 : f32 to vector<8x128xf32>
    %140 = arith.mulf %139, %138 : vector<8x128xf32>
    %141 = math.tanh %140 : vector<8x128xf32>
    %cst_33 = arith.constant 5.000000e-01 : f32
    %142 = vector.broadcast %cst_33 : f32 to vector<8x128xf32>
    %143 = arith.mulf %142, %141 : vector<8x128xf32>
    %cst_34 = arith.constant 5.000000e-01 : f32
    %144 = vector.broadcast %cst_34 : f32 to vector<8x128xf32>
    %145 = arith.addf %143, %144 : vector<8x128xf32>
    %c26 = arith.constant 26 : index
    %146 = memref.load %arg2[%c26] : memref<32xf32, #tpu.memory_space<smem>>
    %147 = vector.broadcast %146 : f32 to vector<8x128xf32>
    %148 = arith.mulf %128, %147 : vector<8x128xf32>
    %c27 = arith.constant 27 : index
    %149 = memref.load %arg2[%c27] : memref<32xf32, #tpu.memory_space<smem>>
    %150 = vector.broadcast %149 : f32 to vector<8x128xf32>
    %151 = arith.mulf %145, %150 : vector<8x128xf32>
    %152 = arith.addf %148, %151 : vector<8x128xf32>
    %c30 = arith.constant 30 : index
    %153 = memref.load %arg2[%c30] : memref<32xf32, #tpu.memory_space<smem>>
    %154 = vector.broadcast %153 : f32 to vector<8x128xf32>
    %155 = arith.addf %152, %154 : vector<8x128xf32>
    %cst_35 = arith.constant 5.000000e-01 : f32
    %156 = vector.broadcast %cst_35 : f32 to vector<8x128xf32>
    %157 = arith.mulf %156, %155 : vector<8x128xf32>
    %158 = math.tanh %157 : vector<8x128xf32>
    %cst_36 = arith.constant 5.000000e-01 : f32
    %159 = vector.broadcast %cst_36 : f32 to vector<8x128xf32>
    %160 = arith.mulf %159, %158 : vector<8x128xf32>
    %cst_37 = arith.constant 5.000000e-01 : f32
    %161 = vector.broadcast %cst_37 : f32 to vector<8x128xf32>
    %162 = arith.addf %160, %161 : vector<8x128xf32>
    %c28 = arith.constant 28 : index
    %163 = memref.load %arg2[%c28] : memref<32xf32, #tpu.memory_space<smem>>
    %164 = vector.broadcast %163 : f32 to vector<8x128xf32>
    %165 = arith.mulf %128, %164 : vector<8x128xf32>
    %c29 = arith.constant 29 : index
    %166 = memref.load %arg2[%c29] : memref<32xf32, #tpu.memory_space<smem>>
    %167 = vector.broadcast %166 : f32 to vector<8x128xf32>
    %168 = arith.mulf %145, %167 : vector<8x128xf32>
    %169 = arith.addf %165, %168 : vector<8x128xf32>
    %c31 = arith.constant 31 : index
    %170 = memref.load %arg2[%c31] : memref<32xf32, #tpu.memory_space<smem>>
    %171 = vector.broadcast %170 : f32 to vector<8x128xf32>
    %172 = arith.addf %169, %171 : vector<8x128xf32>
    %cst_38 = arith.constant 5.000000e-01 : f32
    %173 = vector.broadcast %cst_38 : f32 to vector<8x128xf32>
    %174 = arith.mulf %173, %172 : vector<8x128xf32>
    %175 = math.tanh %174 : vector<8x128xf32>
    %cst_39 = arith.constant 5.000000e-01 : f32
    %176 = vector.broadcast %cst_39 : f32 to vector<8x128xf32>
    %177 = arith.mulf %176, %175 : vector<8x128xf32>
    %cst_40 = arith.constant 5.000000e-01 : f32
    %178 = vector.broadcast %cst_40 : f32 to vector<8x128xf32>
    %179 = arith.addf %177, %178 : vector<8x128xf32>
    %c0_41 = arith.constant 0 : index
    %c0_42 = arith.constant 0 : index
    %c0_43 = arith.constant 0 : index
    %180 = vector.load %arg3[%c0_41, %c0_42, %c0_43] : memref<2x8x128xf32, #tpu.memory_space<vmem>>, vector<1x8x128xf32>
    %181 = vector.shape_cast %180 : vector<1x8x128xf32> to vector<8x128xf32>
    %182 = vector.shape_cast %162 : vector<8x128xf32> to vector<1x8x128xf32>
    tpu.vector_store %arg3[%c0_41, %c0_42, %c0_43], %182 {strides = array<i32>} : memref<2x8x128xf32, #tpu.memory_space<vmem>>, vector<1x8x128xf32>,
    %c1_44 = arith.constant 1 : index
    %c0_45 = arith.constant 0 : index
    %c0_46 = arith.constant 0 : index
    %183 = vector.load %arg3[%c1_44, %c0_45, %c0_46] : memref<2x8x128xf32, #tpu.memory_space<vmem>>, vector<1x8x128xf32>
    %184 = vector.shape_cast %183 : vector<1x8x128xf32> to vector<8x128xf32>
    %185 = vector.shape_cast %179 : vector<8x128xf32> to vector<1x8x128xf32>
    tpu.vector_store %arg3[%c1_44, %c0_45, %c0_46], %185 {strides = array<i32>} : memref<2x8x128xf32, #tpu.memory_space<vmem>>, vector<1x8x128xf32>,
    return
  }
  func.func @transform_0(%arg0: i32) -> (i32, i32, i32) {
    %c0_i32 = arith.constant 0 : i32
    %c0_i32_0 = arith.constant 0 : i32
    %c0_i32_1 = arith.constant 0 : i32
    return %c0_i32, %c0_i32_0, %arg0 : i32, i32, i32
  }
  func.func @transform_1(%arg0: i32) -> i32 {
    %c0_i32 = arith.constant 0 : i32
    %c0_i32_0 = arith.constant 0 : i32
    return %c0_i32 : i32
  }
  func.func @transform_2(%arg0: i32) -> (i32, i32, i32) {
    %c0_i32 = arith.constant 0 : i32
    %c0_i32_0 = arith.constant 0 : i32
    %c0_i32_1 = arith.constant 0 : i32
    return %c0_i32, %c0_i32_0, %arg0 : i32, i32, i32
  }
}

</mosaic_0001>

<bundles_post_ra>
// kernel: namenet_forward.1
= control target key start
LH: loop header
LB: loop body
LE: loop exit
PB: predicated region body
PF: predicated region fallthrough
CT: control target
= control target key end

     0   :  { %7 = vsyncpa [#allocation3], 0  ;;  %s310_s0 = inlined_call_operand.vmem [shape: f32[6,8,128], index: 0, kind: input, shape index: {}]   ;;  %s311_s1 = inlined_call_operand.vmem [shape: f32[32], index: 1, kind: input, shape index: {}]   ;;  %s312_s2 = inlined_call_operand.vmem [shape: f32[2,8,128], index: 2, kind: output, shape index: {}]  }
   0x1   :  { %s16_s11 = sshll.u32 %s311_s1, 4  ;;  %s17_s11 = int_to_ptr.vmem [resolvable:$true] %s16_s11 }
   0x2   :  { %s241_s12 = scalar_lea.vmem %s17_s11, 16  ;;  %p246_p1 = scmp.lt.s32.totalorder %s17_s11, %s17_s11 }
   0x3   :  { %p242_p0 = scmp.ne.s32.totalorder %s17_s11, %s241_s12  ;;  %p247_p2 = scmp.lt.s32.totalorder %s241_s12, %s241_s12 }
   0x5   :  { %p248_p3 = por %p247_p2, %p246_p1 }
   0x7   :  { %p249_p4 = pnand %p248_p3, %p242_p0 }
   0x9   :  { %252 = shalt.err (!%p249_p4)
}
   0xa   :  { %s255_s13 = smov [#allocation2]  }
   0xb   :  { %19 = dma.vmem_to_smem %s17_s11, 16, %s255_s13, [#allocation3]  }
   0xc   :  { %253 = dma.done.wait [#allocation3], 16  }
   0xd   :  { %254 = vsyncadd [#allocation3], 4294967280 }
   0xe   :  { %23 = sfence }
   0xf   :  { %s35_s14 = sld [smem:[#allocation2]]  ;;  %s192_s15 = sld [smem:[#allocation2 + $0x1]]  ;;  %v24_v0 = vld [vmem:[%s310_s0] sm:$0xff]  ;;  %v187_v1 = vld [vmem:[%s310_s0 + $0x8] sm:$0xff]  ;;  %v188_v2 = vld [vmem:[%s310_s0 + $0x10] sm:$0xff] }
  0x10   :  { %s193_s16 = sld [smem:[#allocation2 + $0x2]]  ;;  %s194_s17 = sld [smem:[#allocation2 + $0x3]]  ;;  %v189_v4 = vld [vmem:[%s310_s0 + $0x18] sm:$0xff]  ;;  %v190_v7 = vld [vmem:[%s310_s0 + $0x20] sm:$0xff]  ;;  %v191_v16 = vld [vmem:[%s310_s0 + $0x28] sm:$0xff] }
  0x11   :  { %s195_s18 = sld [smem:[#allocation2 + $0x4]]  ;;  %s274_s19 = sld [smem:[#allocation2 + $0x5]] }
  0x12   :  { %s198_s21 = sld [smem:[#allocation2 + $0x6]]  ;;  %s199_s24 = sld [smem:[#allocation2 + $0x7]] }
  0x13   :  { %s200_s25 = sld [smem:[#allocation2 + $0x8]]  ;;  %s285_s28 = sld [smem:[#allocation2 + $0x9]] }
  0x14   :  { %s287_s29 = sld [smem:[#allocation2 + $0xa]]  ;;  %s292_s4 = sld [smem:[#allocation2 + $0xb]] }
  0x15   :  { %v36_v3 = vstv %s35_s14  ;;  %v39_v6 = vstv %s192_s15  ;;  %s197_s7 = sld [smem:[#allocation2 + $0xc]]  ;;  %s204_s10 = sld [smem:[#allocation2 + $0xd]] }
  0x16   :  { %v37_v5 = vmul.f32 %v36_v3, %v24_v0  ;;  %v40_v8 = vmul.f32 %v187_v1, %v39_v6  ;;  %v43_v9 = vstv %s193_s16  ;;  %v47_v10 = vstv %s194_s17  ;;  %s205_s0 = sld [smem:[#allocation2 + $0xe]]  ;;  %s208_s11 = sld [smem:[#allocation2 + $0x10]] }
  0x17   :  { %v44_v11 = vmul.f32 %v188_v2, %v43_v9  ;;  %v51_v12 = vstv %s195_s18  ;;  %v48_v14 = vmul.f32 %v189_v4, %v47_v10  ;;  %v55_v15 = vstv %s274_s19  ;;  %s206_s12 = sld [smem:[#allocation2 + $0xf]]  ;;  %s209_s13 = sld [smem:[#allocation2 + $0x11]] }
  0x18   :  { %v41_v13 = vadd.f32 %v40_v8, %v37_v5  ;;  %v52_v17 = vmul.f32 %v190_v7, %v51_v12  ;;  %v66_v18 = vstv %s198_s21  ;;  %v69_v19 = vstv %s199_s24  ;;  %s207_s14 = sld [smem:[#allocation2 + $0x12]]  ;;  %s210_s15 = sld [smem:[#allocation2 + $0x13]] }
  0x19   :  { %v73_v20 = vstv %s200_s25  ;;  %v67_v22 = vmul.f32 %v66_v18, %v24_v0  ;;  %v70_v23 = vmul.f32 %v187_v1, %v69_v19  ;;  %v77_v25 = vstv %s285_s28  ;;  %s211_s16 = sld [smem:[#allocation2 + $0x14]]  ;;  %s214_s17 = sld [smem:[#allocation2 + $0x16]] }
  0x1a   :  { %v45_v21 = vadd.f32 %v44_v11, %v41_v13  ;;  %v74_v24 = vmul.f32 %v188_v2, %v73_v20  ;;  %v81_v26 = vstv %s287_s29  ;;  %v56_v28 = vmul.f32 %v191_v16, %v55_v15  ;;  %s212_s18 = sld [smem:[#allocation2 + $0x15]]  ;;  %s215_s19 = sld [smem:[#allocation2 + $0x17]] }
  0x1b   :  { %v71_v29 = vadd.f32 %v70_v23, %v67_v22  ;;  %v78_v30 = vmul.f32 %v189_v4, %v77_v25  ;;  %v85_v31 = vstv %s292_s4  ;;  %v82_v34 = vmul.f32 %v190_v7, %v81_v26  ;;  %s213_s1 = sld [smem:[#allocation2 + $0x18]]  ;;  %s216_s20 = sld [smem:[#allocation2 + $0x19]] }
  0x1c   :  { %v49_v27 = vadd.f32 %v48_v14, %v45_v21  ;;  %v59_v35 = vstv %s197_s7  ;;  %v86_v38 = vmul.f32 %v191_v16, %v85_v31  ;;  %v89_v41 = vstv %s204_s10  ;;  %s217_s21 = sld [smem:[#allocation2 + $0x1a]]  ;;  %s220_s22 = sld [smem:[#allocation2 + $0x1c]] }
  0x1d   :  { %v75_v33 = vadd.f32 %v74_v24, %v71_v29  ;;  %v96_v50 = vstv %s205_s0  ;;  %v110_v51 = vstv %s208_s11  ;;  %v99_v53 = vstv %s206_s12  ;;  %s218_s23 = sld [smem:[#allocation2 + $0x1b]]  ;;  %s221_s24 = sld [smem:[#allocation2 + $0x1d]] }
  0x1e   :  { %v53_v32 = vadd.f32 %v52_v17, %v49_v27  ;;  %v113_v54 = vstv %s209_s13  ;;  %v103_v60 = vstv %s207_s14  ;;  %v117_v61 = vstv %s210_s15  ;;  %s219_s25 = sld [smem:[#allocation2 + $0x1e]]  ;;  %s222_s26 = sld [smem:[#allocation2 + $0x1f]] }
  0x1f   :  { %v79_v37 = vadd.f32 %v78_v30, %v75_v33  ;;  %v124_v8 = vstv %s211_s16  ;;  %v138_v9 = vstv %s214_s17 }
  0x20   :  { %v57_v36 = vadd.f32 %v56_v28, %v53_v32  ;;  %v127_v11 = vstv %s212_s18  ;;  %v141_v12 = vstv %s215_s19 }
  0x21   :  { %v83_v40 = vadd.f32 %v82_v34, %v79_v37  ;;  %v131_v18 = vstv %s213_s1  ;;  %v145_v19 = vstv %s216_s20 }
  0x22   :  { %v60_v39 = vadd.f32 %v59_v35, %v57_v36  ;;  %v152_v30 = vstv %s217_s21  ;;  %v166_v31 = vstv %s220_s22 }
  0x23   :  { %v87_v43 = vadd.f32 %v86_v38, %v83_v40  ;;  %v155_v33 = vstv %s218_s23  ;;  %v169_v34 = vstv %s221_s24 }
  0x24   :  { %v61_v42 = vmul.f32 0.5, %v60_v39  ;;  %v159_v40 = vstv %s219_s25 }
  0x25   :  { %v90_v44 = vadd.f32 %v89_v41, %v87_v43  ;;  %v173_v41 = vstv %s222_s26 }
  0x26   :  { %225 = vtanh.f32 %v61_v42 }
  0x27   :  { %v91_v45 = vmul.f32 0.5, %v90_v44 }
  0x29   :  { %227 = vtanh.f32 %v91_v45 }
  0x30   :  { %v226_v46 = vpop.eup %225 }
  0x31   :  { %v63_v47 = vmul.f32 0.5, %v226_v46 }
  0x33   :  { %v64_v48 = vadd.f32 0.5, %v63_v47  ;;  %v228_v49 = vpop.eup %227 }
  0x34   :  { %v93_v52 = vmul.f32 0.5, %v228_v49 }
  0x35   :  { %v97_v56 = vmul.f32 %v96_v50, %v64_v48  ;;  %v111_v57 = vmul.f32 %v110_v51, %v64_v48 }
  0x36   :  { %v94_v55 = vadd.f32 0.5, %v93_v52 }
  0x38   :  { %v100_v58 = vmul.f32 %v99_v53, %v94_v55  ;;  %v114_v59 = vmul.f32 %v113_v54, %v94_v55 }
  0x3a   :  { %v101_v62 = vadd.f32 %v100_v58, %v97_v56  ;;  %v115_v63 = vadd.f32 %v114_v59, %v111_v57 }
  0x3c   :  { %v104_v0 = vadd.f32 %v103_v60, %v101_v62  ;;  %v118_v1 = vadd.f32 %v117_v61, %v115_v63 }
  0x3e   :  { %v105_v2 = vmul.f32 0.5, %v104_v0  ;;  %v119_v3 = vmul.f32 0.5, %v118_v1 }
  0x40   :  { %229 = vtanh.f32 %v105_v2 }
  0x41   :  { %231 = vtanh.f32 %v119_v3 }
  0x4a   :  { %v230_v4 = vpop.eup %229 }
  0x4b   :  { %v232_v5 = vpop.eup %231  ;;  %v107_v6 = vmul.f32 0.5, %v230_v4 }
  0x4c   :  { %v121_v7 = vmul.f32 0.5, %v232_v5 }
  0x4d   :  { %v108_v10 = vadd.f32 0.5, %v107_v6 }
  0x4e   :  { %v122_v13 = vadd.f32 0.5, %v121_v7 }
  0x4f   :  { %v125_v14 = vmul.f32 %v124_v8, %v108_v10  ;;  %v139_v15 = vmul.f32 %v138_v9, %v108_v10 }
  0x50   :  { %v128_v16 = vmul.f32 %v127_v11, %v122_v13  ;;  %v142_v17 = vmul.f32 %v141_v12, %v122_v13 }
  0x52   :  { %v129_v20 = vadd.f32 %v128_v16, %v125_v14  ;;  %v143_v21 = vadd.f32 %v142_v17, %v139_v15 }
  0x54   :  { %v132_v22 = vadd.f32 %v131_v18, %v129_v20  ;;  %v146_v23 = vadd.f32 %v145_v19, %v143_v21 }
  0x56   :  { %v133_v24 = vmul.f32 0.5, %v132_v22  ;;  %v147_v25 = vmul.f32 0.5, %v146_v23 }
  0x58   :  { %233 = vtanh.f32 %v133_v24 }
  0x59   :  { %235 = vtanh.f32 %v147_v25 }
  0x62   :  { %v234_v26 = vpop.eup %233 }
  0x63   :  { %v236_v27 = vpop.eup %235  ;;  %v135_v28 = vmul.f32 0.5, %v234_v26 }
  0x64   :  { %v149_v29 = vmul.f32 0.5, %v236_v27 }
  0x65   :  { %v136_v32 = vadd.f32 0.5, %v135_v28 }
  0x66   :  { %v150_v35 = vadd.f32 0.5, %v149_v29 }
  0x67   :  { %v153_v36 = vmul.f32 %v152_v30, %v136_v32  ;;  %v167_v37 = vmul.f32 %v166_v31, %v136_v32 }
  0x68   :  { %v156_v38 = vmul.f32 %v155_v33, %v150_v35  ;;  %v170_v39 = vmul.f32 %v169_v34, %v150_v35 }
  0x6a   :  { %v157_v42 = vadd.f32 %v156_v38, %v153_v36  ;;  %v171_v43 = vadd.f32 %v170_v39, %v167_v37 }
  0x6c   :  { %v160_v44 = vadd.f32 %v159_v40, %v157_v42  ;;  %v174_v45 = vadd.f32 %v173_v41, %v171_v43 }
  0x6e   :  { %v161_v46 = vmul.f32 0.5, %v160_v44  ;;  %v175_v47 = vmul.f32 0.5, %v174_v45 }
  0x70   :  { %237 = vtanh.f32 %v161_v46 }
  0x71   :  { %239 = vtanh.f32 %v175_v47 }
  0x7a   :  { %v238_v48 = vpop.eup %237 }
  0x7b   :  { %v240_v49 = vpop.eup %239  ;;  %v163_v50 = vmul.f32 0.5, %v238_v48 }
  0x7c   :  { %v177_v51 = vmul.f32 0.5, %v240_v49 }
  0x7d   :  { %v164_v52 = vadd.f32 0.5, %v163_v50 }
  0x7e   :  { %v178_v53 = vadd.f32 0.5, %v177_v51 }
  0x7f   :  { %179 = vst [vmem:[%s312_s2] sm:$0xff] %v164_v52 }
  0x80   :  { %223 = vst [vmem:[%s312_s2 + $0x8] sm:$0xff] %v178_v53 }
  0x81   :  { %186 = vsyncpa [#allocation3], 1 }

</bundles_post_ra>
